<compile_context>
chip_gen: v7x
topology: tpu7x:2x2x1
jax: 0.10.0
libtpu: 0.0.40
codegen_flags: <defaults>
</compile_context>

<pallas_src>
import functools

import jax
import jax.numpy as jnp
from jax.experimental import pallas as pl
from jax.experimental.pallas import tpu as pltpu


def _stats_kernel(x_ref, s_ref):
    """Accumulate per-channel (sum, tile-centered sum of squares, n*mean^2)."""
    th, W, C = x_ref.shape
    cnt = float(th * W)
    x = x_ref[...].astype(jnp.float32).reshape(th * W, C)
    s = jnp.sum(x, axis=0, keepdims=True)                 # (1, C)
    m = s * (1.0 / cnt)
    d = x - m
    css = jnp.sum(d * d, axis=0, keepdims=True)           # (1, C)
    nm2 = cnt * m * m                                      # (1, C)
    upd = jnp.concatenate([s, css, nm2], axis=0)           # (3, C)

    @pl.when(pl.program_id(1) == 0)
    def _():
        s_ref[...] = jnp.zeros_like(s_ref)

    s_ref[...] += upd


def _apply_kernel(x_ref, top_ref, bot_ref, aff_ref, w_ref, b_ref, o_ref,
                  *, conv_dtype):
    """normalize + SiLU + 3x3 conv for one (batch, H-tile) block."""
    th, W, C = x_ref.shape
    c3 = w_ref.shape[-1]          # 3 * Cout (the 3 dx taps packed together)
    Cout = c3 // 3
    i = pl.program_id(1)
    last = pl.num_programs(1) - 1

    scale = aff_ref[0:1, :]       # (1, C)  f32: gamma * inv_std(group)
    shift = aff_ref[1:2, :]       # (1, C)  f32: beta - mean(group) * scale

    def norm_silu(v):
        y = v.astype(jnp.float32) * scale + shift
        return y * jax.nn.sigmoid(y)

    y_main = norm_silu(x_ref[...].reshape(th * W, C))      # (th*W, C)
    y_top = norm_silu(top_ref[...])                        # (W, C) halo row
    y_bot = norm_silu(bot_ref[...])                        # (W, C) halo row
    # conv zero-padding in H: halo rows outside the image must be zero
    # *after* groupnorm + silu.
    y_top = jnp.where(i == 0, jnp.zeros_like(y_top), y_top)
    y_bot = jnp.where(i == last, jnp.zeros_like(y_bot), y_bot)

    y_ext = jnp.concatenate([y_top, y_main, y_bot], axis=0)   # ((th+2)*W, C)
    y_ext = y_ext.astype(conv_dtype)

    # 3 matmuls (one per dy), each contracting C against the 3 dx taps packed
    # along the output dim; accumulate in f32.
    acc = jnp.zeros((th * W, c3), jnp.float32)
    for dy in range(3):
        s_dy = y_ext[dy * W: dy * W + th * W, :]           # rows h + dy - 1
        acc = acc + jnp.dot(s_dy, w_ref[dy],
                            preferred_element_type=jnp.float32)

    # dx shifts on the small (th, W, 3*Cout) partial result (zero pad along W)
    acc3 = acc.reshape(th, W, c3)
    accp = jnp.pad(acc3, ((0, 0), (1, 1), (0, 0)))
    out = (accp[:, 0:W, 0:Cout]                            # dx = -1 tap
           + accp[:, 1:W + 1, Cout:2 * Cout]               # dx =  0 tap
           + accp[:, 2:W + 2, 2 * Cout:3 * Cout])          # dx = +1 tap
    out = out + b_ref[...]                                  # (1, Cout) bcast
    # TODO(synk): for large Cout, write channels-first (Cout, th, W) here to
    # get fully lane-dense stores; with Cout=4 the output is <2% of traffic.
    o_ref[...] = out.reshape(th * W, Cout).astype(o_ref.dtype)


def _pick_tile_h(H, W, C, budget_bytes=2 << 20):
    """Largest H-tile dividing H whose f32 activation block fits the budget."""
    cands = [th for th in range(1, H + 1)
             if H % th == 0 and (th == H or (th * W) % 8 == 0)]
    fitting = [th for th in cands if th * W * C * 4 <= budget_bytes]
    return max(fitting) if fitting else min(cands)


def unet_output_layer_nhwc(x_nhwc, gamma, beta, w_oihw, bias, *,
                           num_groups=32, eps=1e-5,
                           conv_dtype=jnp.bfloat16, tile_h=None):
    """GroupNorm -> SiLU -> 3x3 conv on NHWC activations. Returns NHWC."""
    N, H, W, C = x_nhwc.shape
    Cout = w_oihw.shape[0]
    G = num_groups
    assert C % G == 0, "GroupNorm requires C % num_groups == 0"
    Cg = C // G

    if tile_h is None:
        tile_h = _pick_tile_h(H, W, C)
    assert H % tile_h == 0
    n_th = H // tile_h
    HW = H * W

    # ---------------- pass A: per-channel partial statistics ----------------
    stats = pl.pallas_call(
        _stats_kernel,
        out_shape=jax.ShapeDtypeStruct((N, 3, C), jnp.float32),
        grid=(N, n_th),
        in_specs=[pl.BlockSpec((None, tile_h, W, C),
                               lambda n, i: (n, i, 0, 0))],
        out_specs=pl.BlockSpec((None, 3, C), lambda n, i: (n, 0, 0)),
        compiler_params=pltpu.CompilerParams(
            dimension_semantics=("parallel", "arbitrary"),
            vmem_limit_bytes=32 * 1024 * 1024),
    )(x_nhwc)

    # ---- group combine + affine folding (tiny (N, C) arrays, plain JAX) ----
    S, CSS, NM2 = stats[:, 0], stats[:, 1], stats[:, 2]          # (N, C)
    mean_c = S / HW
    m2_c = CSS + NM2 - HW * mean_c * mean_c          # per-channel sum (x-mu_c)^2
    mean_g = S.reshape(N, G, Cg).sum(-1) / (HW * Cg)             # (N, G)
    m2_g = (m2_c.reshape(N, G, Cg).sum(-1)
            + HW * (mean_c * mean_c).reshape(N, G, Cg).sum(-1)
            - (HW * Cg) * mean_g * mean_g)
    var_g = m2_g / (HW * Cg)                                     # biased var
    inv_g = jax.lax.rsqrt(var_g + eps)
    inv_c = jnp.repeat(inv_g, Cg, axis=1)                        # (N, C)
    meang_c = jnp.repeat(mean_g, Cg, axis=1)
    scale = gamma[None, :].astype(jnp.float32) * inv_c
    shift = beta[None, :].astype(jnp.float32) - meang_c * scale
    affine = jnp.stack([scale, shift], axis=1)                   # (N, 2, C)

    # ---- halo rows: one row above / below each tile (tiny gathers; no
    # overlapping BlockSpecs and no whole-image padding) ----
    zrow = jnp.zeros((N, 1, W, C), x_nhwc.dtype)
    top = jnp.concatenate(
        [zrow, x_nhwc[:, tile_h - 1:H - 1:tile_h]], axis=1)      # (N, n_th, W, C)
    bot = jnp.concatenate(
        [x_nhwc[:, tile_h::tile_h], zrow], axis=1)               # (N, n_th, W, C)

    # packed conv weights: wpack[dy, c, dx*Cout + co] = w[co, c, dy, dx]
    wpack = jnp.transpose(w_oihw, (2, 1, 3, 0)).reshape(3, C, 3 * Cout)
    wpack = wpack.astype(conv_dtype)
    bias2 = bias.reshape(1, Cout).astype(jnp.float32)

    kernel = functools.partial(_apply_kernel, conv_dtype=conv_dtype)
    out_flat = pl.pallas_call(
        kernel,
        out_shape=jax.ShapeDtypeStruct((N, HW, Cout), x_nhwc.dtype),
        grid=(N, n_th),
        in_specs=[
            pl.BlockSpec((None, tile_h, W, C), lambda n, i: (n, i, 0, 0)),
            pl.BlockSpec((None, None, W, C), lambda n, i: (n, i, 0, 0)),
            pl.BlockSpec((None, None, W, C), lambda n, i: (n, i, 0, 0)),
            pl.BlockSpec((None, 2, C), lambda n, i: (n, 0, 0)),
            pl.BlockSpec((3, C, 3 * Cout), lambda n, i: (0, 0, 0)),
            pl.BlockSpec((1, Cout), lambda n, i: (0, 0)),
        ],
        out_specs=pl.BlockSpec((None, tile_h * W, Cout), lambda n, i: (n, i, 0)),
        compiler_params=pltpu.CompilerParams(
            dimension_semantics=("parallel", "parallel"),
            vmem_limit_bytes=32 * 1024 * 1024),
    )(x_nhwc, top, bot, affine, wpack, bias2)

    return out_flat.reshape(N, H, W, Cout)


def unet_output_layer(x_nchw, gamma, beta, w_oihw, bias, *,
                      num_groups=32, eps=1e-5,
                      conv_dtype=jnp.bfloat16, tile_h=None):
    """PyTorch-layout entry point (NCHW in / NCHW out), matching the module."""
    # Input transpose is the only full-size layout pass; callers that already
    # hold NHWC activations should call unet_output_layer_nhwc directly.
    x_nhwc = jnp.transpose(x_nchw, (0, 2, 3, 1))
    out_nhwc = unet_output_layer_nhwc(
        x_nhwc, gamma, beta, w_oihw, bias, num_groups=num_groups, eps=eps,
        conv_dtype=conv_dtype, tile_h=tile_h)
    # Output transpose is over the tiny Cout=4 tensor (negligible traffic).
    return jnp.transpose(out_nhwc, (0, 3, 1, 2))


def _reference(x, gamma, beta, w, bias, num_groups=32, eps=1e-5):
    """Pure-JAX reference matching the PyTorch module."""
    N, C, H, W = x.shape
    xg = x.reshape(N, num_groups, C // num_groups, H, W)
    mean = xg.mean(axis=(2, 3, 4), keepdims=True)
    var = ((xg - mean) ** 2).mean(axis=(2, 3, 4), keepdims=True)
    xn = ((xg - mean) / jnp.sqrt(var + eps)).reshape(N, C, H, W)
    xn = xn * gamma[None, :, None, None] + beta[None, :, None, None]
    xs = xn * jax.nn.sigmoid(xn)
    out = jax.lax.conv_general_dilated(
        xs, w, window_strides=(1, 1), padding=((1, 1), (1, 1)),
        dimension_numbers=("NCHW", "OIHW", "NCHW"))
    return out + bias[None, :, None, None]


if __name__ == "__main__":
    # GroupNorm(32, C) needs C % 32 == 0; Cout = 4 like the SD UNet head.
    N, C_in, C_out, H, W = 2, 64, 4, 16, 16

    key = jax.random.PRNGKey(0)
    k_x, k_g, k_b, k_w, k_c = jax.random.split(key, 5)
    x = jax.random.normal(k_x, (N, C_in, H, W), dtype=jnp.float32)
    gamma = 1.0 + 0.1 * jax.random.normal(k_g, (C_in,), dtype=jnp.float32)
    beta = 0.1 * jax.random.normal(k_b, (C_in,), dtype=jnp.float32)
    w = 0.05 * jax.random.normal(k_w, (C_out, C_in, 3, 3), dtype=jnp.float32)
    bias = 0.1 * jax.random.normal(k_c, (C_out,), dtype=jnp.float32)

    ref = _reference(x, gamma, beta, w, bias)

    # exact-path check (f32 conv operands), multi-tile grid: 2 H-tiles + halos
    out_f32 = unet_output_layer(x, gamma, beta, w, bias,
                                conv_dtype=jnp.float32, tile_h=8)
    out_f32 = jax.block_until_ready(out_f32)
    assert out_f32.shape == (N, C_out, H, W)
    assert jnp.allclose(out_f32, ref, atol=5e-4, rtol=5e-4), "f32 path mismatch"

    # default fast path: bf16 conv operands (f32 accumulation, f32 stats)
    out_bf16 = unet_output_layer(x, gamma, beta, w, bias, tile_h=8)
    out_bf16 = jax.block_until_ready(out_bf16)
    assert jnp.allclose(out_bf16, ref, atol=4e-2, rtol=4e-2), "bf16 path mismatch"

    # auto tile selection (single tile at this toy size)
    out_auto = unet_output_layer(x, gamma, beta, w, bias,
                                 conv_dtype=jnp.float32)
    out_auto = jax.block_until_ready(out_auto)
    assert jnp.allclose(out_auto, ref, atol=5e-4, rtol=5e-4), "auto-tile mismatch"

    print("KERNEL_OK")
</pallas_src>

<mosaic_0001>
module attributes {stable_mosaic.version = 11 : i64} {
  func.func @_stats_kernel(%arg0: i32, %arg1: i32, %arg2: memref<1x8x16x64xf32, #tpu.memory_space<vmem>>, %arg3: memref<1x3x64xf32, #tpu.memory_space<vmem>>) attributes {dimension_semantics = [#tpu.dimension_semantics<parallel>, #tpu.dimension_semantics<arbitrary>], iteration_bounds = array<i64: 2, 2>, scalar_prefetch = 0 : i64, scratch_operands = 0 : i64, tpu.core_type = #tpu.core_type<tc>, window_params = [{transform_indices = @transform_0, window_bounds = array<i64: 1, 8, 16, 64>}, {transform_indices = @transform_1, window_bounds = array<i64: 1, 3, 64>}]} {
    %c0 = arith.constant 0 : index
    %c0_0 = arith.constant 0 : index
    %c0_1 = arith.constant 0 : index
    %c0_2 = arith.constant 0 : index
    %0 = vector.load %arg2[%c0, %c0_0, %c0_1, %c0_2] : memref<1x8x16x64xf32, #tpu.memory_space<vmem>>, vector<1x8x16x64xf32>
    %1 = vector.shape_cast %0 : vector<1x8x16x64xf32> to vector<8x16x64xf32>
    %2 = vector.shape_cast %1 : vector<8x16x64xf32> to vector<128x64xf32>
    %cst = arith.constant dense<0.000000e+00> : vector<64xf32>
    %3 = vector.multi_reduction <add>, %2, %cst [0] : vector<128x64xf32> to vector<64xf32>
    %4 = vector.shape_cast %3 : vector<64xf32> to vector<1x64xf32>
    %cst_3 = arith.constant 7.812500e-03 : f32
    %5 = vector.broadcast %cst_3 : f32 to vector<1x64xf32>
    %6 = arith.mulf %4, %5 : vector<1x64xf32>
    %7 = vector.broadcast %6 : vector<1x64xf32> to vector<128x64xf32>
    %8 = arith.subf %2, %7 : vector<128x64xf32>
    %9 = arith.mulf %8, %8 : vector<128x64xf32>
    %cst_4 = arith.constant dense<0.000000e+00> : vector<64xf32>
    %10 = vector.multi_reduction <add>, %9, %cst_4 [0] : vector<128x64xf32> to vector<64xf32>
    %11 = vector.shape_cast %10 : vector<64xf32> to vector<1x64xf32>
    %cst_5 = arith.constant 1.280000e+02 : f32
    %12 = vector.broadcast %cst_5 : f32 to vector<1x64xf32>
    %13 = arith.mulf %12, %6 : vector<1x64xf32>
    %14 = arith.mulf %13, %6 : vector<1x64xf32>
    %15 = tpu.concatenate %4, %11, %14 in 0 : vector<1x64xf32>, vector<1x64xf32>, vector<1x64xf32> -> vector<3x64xf32>
    %c0_i32 = arith.constant 0 : i32
    %16 = arith.cmpi eq, %arg1, %c0_i32 : i32
    %17 = arith.extui %16 : i1 to i32
    %c0_i32_6 = arith.constant 0 : i32
    %18 = arith.cmpi ne, %17, %c0_i32_6 : i32
    scf.if %18 {
      %cst_13 = arith.constant 0.000000e+00 : f32
      %25 = vector.broadcast %cst_13 : f32 to vector<3x64xf32>
      %c0_14 = arith.constant 0 : index
      %c0_15 = arith.constant 0 : index
      %c0_16 = arith.constant 0 : index
      %26 = vector.load %arg3[%c0_14, %c0_15, %c0_16] : memref<1x3x64xf32, #tpu.memory_space<vmem>>, vector<1x3x64xf32>
      %27 = vector.shape_cast %26 : vector<1x3x64xf32> to vector<3x64xf32>
      %28 = vector.shape_cast %25 : vector<3x64xf32> to vector<1x3x64xf32>
      tpu.vector_store %arg3[%c0_14, %c0_15, %c0_16], %28 {strides = array<i32>} : memref<1x3x64xf32, #tpu.memory_space<vmem>>, vector<1x3x64xf32>,
    } else {
    }
    %c0_7 = arith.constant 0 : index
    %c0_8 = arith.constant 0 : index
    %c0_9 = arith.constant 0 : index
    %19 = vector.load %arg3[%c0_7, %c0_8, %c0_9] : memref<1x3x64xf32, #tpu.memory_space<vmem>>, vector<1x3x64xf32>
    %20 = vector.shape_cast %19 : vector<1x3x64xf32> to vector<3x64xf32>
    %21 = arith.addf %20, %15 : vector<3x64xf32>
    %c0_10 = arith.constant 0 : index
    %c0_11 = arith.constant 0 : index
    %c0_12 = arith.constant 0 : index
    %22 = vector.load %arg3[%c0_10, %c0_11, %c0_12] : memref<1x3x64xf32, #tpu.memory_space<vmem>>, vector<1x3x64xf32>
    %23 = vector.shape_cast %22 : vector<1x3x64xf32> to vector<3x64xf32>
    %24 = vector.shape_cast %21 : vector<3x64xf32> to vector<1x3x64xf32>
    tpu.vector_store %arg3[%c0_10, %c0_11, %c0_12], %24 {strides = array<i32>} : memref<1x3x64xf32, #tpu.memory_space<vmem>>, vector<1x3x64xf32>,
    return
  }
  func.func @transform_0(%arg0: i32, %arg1: i32) -> (i32, i32, i32, i32) {
    %c0_i32 = arith.constant 0 : i32
    %c0_i32_0 = arith.constant 0 : i32
    %c0_i32_1 = arith.constant 0 : i32
    return %arg0, %arg1, %c0_i32, %c0_i32_0 : i32, i32, i32, i32
  }
  func.func @transform_1(%arg0: i32, %arg1: i32) -> (i32, i32, i32) {
    %c0_i32 = arith.constant 0 : i32
    %c0_i32_0 = arith.constant 0 : i32
    %c0_i32_1 = arith.constant 0 : i32
    return %arg0, %c0_i32, %c0_i32_0 : i32, i32, i32
  }
}

</mosaic_0001>

<bundles_post_ra>
// kernel: tpu_custom_call.1
= control target key start
LH: loop header
LB: loop body
LE: loop exit
PB: predicated region body
PF: predicated region fallthrough
CT: control target
= control target key end

     0   :  { %6 = vsyncpa [#allocation3], 0  ;;  %s805_s0 = inlined_call_operand.hbm [shape: f32[2,16,16,64], index: 0, kind: input, shape index: {}]   ;;  %s806_s1 = inlined_call_operand.vmem [shape: f32[2,3,64], index: 1, kind: output, shape index: {}]  }
   0x1   :  { %8 = vsyncpa [#allocation3 + $0x1], 0  ;;  %s574_s6 = smov 0   ;;  %s576_s7 = smov 0  }
   0x2   :  { %s578_s8 = smov 0   ;;  %s580_s9 = smov 0  }
   0x3   :  { %s582_s10 = smov 0   ;;  %s584_s11 = smov 0  }
   0x4   :  { %s586_s12 = smov 0   ;;  %s588_s13 = smov 0  }
   0x5 LB: > { %s372_s14 = sadd.s32 4294967295, %s558_s13   ;;  %s23_s15 = sadd.s32 1, %s550_s11  ;;  %s558_s13 = sphi %s588_s13, %s14_s13   ;;  %s554_s12 = sphi %s586_s12, %s817_s12   ;;  %s550_s11 = sphi %s584_s11, %s816_s11   ;;  %s546_s10 = sphi %s582_s10, %s815_s10   ;;  %s542_s9 = sphi %s580_s9, %s814_s9   ;;  %s538_s8 = sphi %s578_s8, %s813_s8   ;;  %s534_s7 = sphi %s576_s7, %s812_s7   ;;  %s530_s6 = sphi %s574_s6, %s811_s6  }
   0x6   : > { %p24_p0 = scmp.ge.s32.totalorder %s23_s15, 2  ;;  %s26_s16 = sadd.s32 1, %s554_s12 }
   0x7   : > { %s35_s17 = sadd.s32 1, %s538_s8  ;;  %p42_p1 = scmp.ne.s32.totalorder %s538_s8, %s534_s7 }
   0x8   : > { %s819_s15 = smov (%p24_p0, %s23_s15), 0  ;;  %s821_s16 = smov (!%p24_p0, %s26_s16), %s554_s12 }
   0x9   : > { %s31_s18 = ssub.s32 %s550_s11, %s819_s15  ;;  %p43_p2 = scmp.eq.s32.totalorder %s558_s13, 0 }
   0xa   : > { %p28_p3 = scmp.ge.s32.totalorder %s821_s16, 2  ;;  %p48_p4 = scmp.ne.s32.totalorder %s534_s7, %s530_s6 }
   0xb   : > { %p625_p5 = por %p43_p2, %p42_p1  ;;  %p49_p6 = scmp.eq.s32.totalorder %s372_s14, 0 }
   0xc   : > { %s823_s16 = smov (%p28_p3, %s821_s16), 0  ;;  %p394_p8 = scmp.lt.s32.totalorder %s558_s13, 4 }
   0xd   : > { %p631_p7 = por %p49_p6, %p48_p4  ;;  %s30_s21 = ssub.s32 %s554_s12, %s823_s16 }
   0xe   : > { %s32_s22 = sor.u32 %s31_s18, %s30_s21  ;;  %s98_s23 = sand.u32 1, %s538_s8  }
   0xf   : > { %p33_p9 = scmp.eq.s32.totalorder %s32_s22, 0  ;;  %s376_s24 = sshll.u32 %s98_s23, 7 }
  0x10   : > { %s387_s25 = sshll.u32 %s550_s11, 4  ;;  %s379_s27 = sshll.u32 %s554_s12, 5 }
  0x11   : > { %s641_s26 = scalar_select %p33_p9, %s538_s8, %s35_s17  }
  0x12   : > { %s109_s28 = sadd.s32 %s387_s25, %s379_s27  ;;  %s102_s29 = scalar_lea.vmem [#allocation2], %s376_s24 }
  0x13   : > { %s112_s30 = sshll.u32 %s102_s29, 4  ;;  %s380_s2 = sshll.u32 %s109_s28, 7  ;;  %s644_s30 = int_to_ptr.vmem [resolvable:$true] %s112_s30 }
  0x14   : > { %s649_s5 = scalar_lea.hbm %s805_s0, %s380_s2  ;;  %p655_p10 = pnand %p394_p8, %p625_p5 }
  0x15   : > { %s660_s14 = scalar_lea.sflag [#allocation3], %s98_s23  ;;  %s462_s17 = scalar_lea.hbm %s649_s5, 2048 }
  0x16   : > { %p463_p12 = scmp.ne.s32.totalorder %s649_s5, %s462_s17  ;;  %p464_p13 = pneg %p655_p10 }
  0x17   : > { %s467_s21 = scalar_lea.hbm %s805_s0, 8192  ;;  %p468_p2 = scmp.lt.u32.totalorder %s649_s5, %s805_s0 }
  0x18   : > { %p465_p0 = pnand %p464_p13, %p463_p12  ;;  %p469_p3 = scmp.lt.u32.totalorder %s467_s21, %s462_s17 }
  0x19   : > { %p471_p5 = scmp.lt.u32.totalorder %s462_s17, %s649_s5 }
  0x1a   : > { %p466_p1 = pneg %p465_p0  ;;  %p470_p4 = por %p469_p3, %p468_p2 }
  0x1c   : > { %p472_p6 = por %p471_p5, %p470_p4 }
  0x1e   : > { %p473_p8 = pnand %p472_p6, %p466_p1 }
  0x20   : > { %476 = shalt.err (!%p473_p8)
}
  0x21   : > { %s477_s23 = scalar_lea.vmem %s644_s30, 2048  ;;  %s560_s25 = smov [#allocation2]  }
  0x22   : > { %p478_p9 = scmp.ne.s32.totalorder %s644_s30, %s477_s23  ;;  %s482_s27 = sshll.u32 %s560_s25, 4  ;;  %s483_s27 = int_to_ptr.vmem [resolvable:$false] %s482_s27 }
  0x23   : > { %s484_s28 = scalar_lea.vmem %s483_s27, 4096  ;;  %p485_p11 = scmp.lt.s32.totalorder %s644_s30, %s483_s27 }
  0x24   : > { %p480_p12 = pnand %p478_p9, %p464_p13  ;;  %p486_p2 = scmp.lt.s32.totalorder %s484_s28, %s477_s23 }
  0x26   : > { %p481_p0 = pneg %p480_p12  ;;  %p487_p3 = por %p486_p2, %p485_p11 }
  0x28   : > { %p488_p4 = pnand %p487_p3, %p481_p0 }
  0x2a   : > { %491 = shalt.err (!%p488_p4)
}
  0x2b   : > { %s561_s29 = smov 128   ;;  %s562_s2 = smov 8  }
  0x2c   : > { %393 = dma.hbm_to_vmem [thread:$0]  (!%p655_p10), %s649_s5, 2048, %s644_s30, %s660_s14, %s561_s29, %s561_s29, %s562_s2  }
  0x2d   : > { %p120_p13 = scmp.lt.s32.totalorder %s558_s13, 5  ;;  %p810_p1 = scmp.ge.s32.totalorder %s558_s13, 1 }
  0x2f   : > { %p121_p5 = pnand %p810_p1, %p120_p13 }
  0x30   : > { %s126_s3 = sand.u32 (!%p121_p5), 1, %s534_s7  }
  0x31   : > { %124 = sbr.rel (%p121_p5) target bundleno = 156 (0x9c), region = 24  ;;  %s382_s4 = sshll.u32 (!%p121_p5), %s126_s3, 7 }
  0x32   : > { %s127_s17 = scalar_lea.sflag (!%p121_p5), [#allocation3], %s126_s3  ;;  %s692_s18 = scalar_lea.vmem (!%p121_p5), [#allocation2], %s382_s4 }
  0x38   : > { %525 = dma.done.wait (%p631_p7), %s127_s17, 2048  }
  0x39   : > { %527 = vsyncadd (%p631_p7), %s127_s17, 4294965248  ;;  %p149_p10 = scmp.lt.s32.totalorder %s546_s10, 1  ;;  %vm169_vm0 = vcmask 523264   ;;  %v153_v0 = vld [vmem:[%s692_s18] sm:$0xff]  ;;  %v154_v1 = vld [vmem:[%s692_s18 + $0x8] sm:$0xff]  ;;  %vm279_vm1 = vcmask 1040384  }
  0x3a   : > { %v155_v2 = vld [vmem:[%s692_s18 + $0x10] sm:$0xff]  ;;  %v156_v3 = vld [vmem:[%s692_s18 + $0x18] sm:$0xff]  ;;  %v170_v4 = vsel %vm169_vm0, %v153_v0, 0.0  ;;  %v171_v5 = vsel %vm169_vm0, %v154_v1, 0.0  ;;  %v157_v7 = vld [vmem:[%s692_s18 + $0x20] sm:$0xff]  ;;  %vm281_vm2 = vcmask 1041408  }
  0x3b   : > { %s825_s10 = smov (!%p149_p10, %s546_s10), 1  ;;  %v173_v6 = vsel %vm169_vm0, %v155_v2, 0.0  ;;  %v172_v8 = vadd.f32 %v171_v5, %v170_v4  ;;  %v175_v9 = vsel %vm169_vm0, %v156_v3, 0.0  ;;  %v158_v10 = vld [vmem:[%s692_s18 + $0x28] sm:$0xff]  ;;  %v177_v12 = vsel %vm169_vm0, %v157_v7, 0.0  ;;  %v159_v13 = vld [vmem:[%s692_s18 + $0x30] sm:$0xff] }
  0x3c   : > { %s383_s30 = sshll.u32 %s825_s10, 2  ;;  %v179_v15 = vsel %vm169_vm0, %v158_v10, 0.0  ;;  %v160_v16 = vld [vmem:[%s692_s18 + $0x38] sm:$0xff]  ;;  %v181_v18 = vsel %vm169_vm0, %v159_v13, 0.0  ;;  %v161_v19 = vld [vmem:[%s692_s18 + $0x40] sm:$0xff]  ;;  %v162_v22 = vld [vmem:[%s692_s18 + $0x48] sm:$0xff] }
  0x3d   : > { %s703_s14 = scalar_lea.vmem %s806_s1, %s383_s30  ;;  %v174_v11 = vadd.f32 %v173_v6, %v172_v8  ;;  %v183_v21 = vsel %vm169_vm0, %v160_v16, 0.0  ;;  %v185_v24 = vsel %vm169_vm0, %v161_v19, 0.0  ;;  %v163_v25 = vld [vmem:[%s692_s18 + $0x50] sm:$0xff]  ;;  %v187_v27 = vsel %vm169_vm0, %v162_v22, 0.0  ;;  %v164_v28 = vld [vmem:[%s692_s18 + $0x58] sm:$0xff]  ;;  %v165_v31 = vld [vmem:[%s692_s18 + $0x60] sm:$0xff] }
  0x3e   : > { %v189_v30 = vsel %vm169_vm0, %v163_v25, 0.0  ;;  %v191_v33 = vsel %vm169_vm0, %v164_v28, 0.0  ;;  %v166_v34 = vld [vmem:[%s692_s18 + $0x68] sm:$0xff]  ;;  %v193_v36 = vsel %vm169_vm0, %v165_v31, 0.0  ;;  %v167_v37 = vld [vmem:[%s692_s18 + $0x70] sm:$0xff]  ;;  %v168_v40 = vld [vmem:[%s692_s18 + $0x78] sm:$0xff] }
  0x3f   : > { %v176_v14 = vadd.f32 %v175_v9, %v174_v11  ;;  %v195_v39 = vsel %vm169_vm0, %v166_v34, 0.0  ;;  %v197_v42 = vsel %vm169_vm0, %v167_v37, 0.0  ;;  %v199_v44 = vsel %vm169_vm0, %v168_v40, 0.0  ;;  %p384_p7 = scmp.ne.s32.totalorder %s542_s9, 0 }
  0x40   : > { %vm287_vm3 = vcmask (!%p384_p7), 518144  }
  0x41   : > { %v178_v17 = vadd.f32 %v177_v12, %v176_v14 }
  0x43   : > { %v180_v20 = vadd.f32 %v179_v15, %v178_v17 }
  0x45   : > { %v182_v23 = vadd.f32 %v181_v18, %v180_v20 }
  0x47   : > { %v184_v26 = vadd.f32 %v183_v21, %v182_v23 }
  0x49   : > { %v186_v29 = vadd.f32 %v185_v24, %v184_v26 }
  0x4b   : > { %v188_v32 = vadd.f32 %v187_v27, %v186_v29 }
  0x4d   : > { %v190_v35 = vadd.f32 %v189_v30, %v188_v32 }
  0x4f   : > { %v192_v38 = vadd.f32 %v191_v33, %v190_v35 }
  0x51   : > { %v194_v41 = vadd.f32 %v193_v36, %v192_v38 }
  0x53   : > { %v196_v43 = vadd.f32 %v195_v39, %v194_v41 }
  0x55   : > { %v198_v45 = vadd.f32 %v197_v42, %v196_v43 }
  0x57   : > { %v200_v46 = vadd.f32 %v199_v44, %v198_v45 }
  0x59   : > { %v201_v47 = vrot.slane %v200_v46, 4 }
  0x5b   : > { %v202_v48 = vadd.f32 %v201_v47, %v200_v46 }
  0x5d   : > { %v203_v49 = vrot.slane %v202_v48, 2 }
  0x5f   : > { %v204_v50 = vadd.f32 %v203_v49, %v202_v48 }
  0x61   : > { %v205_v51 = vrot.slane %v204_v50, 1 }
  0x63   : > { %v737_v52 = vadd.f32 %v205_v51, %v204_v50 }
  0x65   : > { %v740_v53 = vmul.f32 0.0078125, %v737_v52 }
  0x67   : > { %v208_v54 = vsub.f32 %v153_v0, %v740_v53  ;;  %v209_v55 = vsub.f32 %v154_v1, %v740_v53  ;;  %v210_v56 = vsub.f32 %v155_v2, %v740_v53  ;;  %v211_v57 = vsub.f32 %v156_v3, %v740_v53 }
  0x68   : > { %v212_v58 = vsub.f32 %v157_v7, %v740_v53  ;;  %v213_v62 = vsub.f32 %v158_v10, %v740_v53  ;;  %v214_v4 = vsub.f32 %v159_v13, %v740_v53  ;;  %v215_v3 = vsub.f32 %v160_v16, %v740_v53 }
  0x69   : > { %v224_v59 = vmul.f32 %v208_v54, %v208_v54  ;;  %v225_v60 = vmul.f32 %v209_v55, %v209_v55  ;;  %v226_v61 = vmul.f32 %v210_v56, %v210_v56  ;;  %v227_v63 = vmul.f32 %v211_v57, %v211_v57 }
  0x6a   : > { %v228_v5 = vmul.f32 %v212_v58, %v212_v58  ;;  %v229_v8 = vmul.f32 %v213_v62, %v213_v62  ;;  %v216_v11 = vsub.f32 %v161_v19, %v740_v53  ;;  %v230_v10 = vmul.f32 %v214_v4, %v214_v4 }
  0x6b   : > { %v240_v6 = vsel %vm169_vm0, %v224_v59, 0.0  ;;  %v241_v0 = vsel %vm169_vm0, %v225_v60, 0.0  ;;  %v243_v1 = vsel %vm169_vm0, %v226_v61, 0.0  ;;  %v245_v7 = vsel %vm169_vm0, %v227_v63, 0.0 }
  0x6c   : > { %v242_v2 = vadd.f32 %v241_v0, %v240_v6  ;;  %v247_v12 = vsel %vm169_vm0, %v228_v5, 0.0  ;;  %v217_v14 = vsub.f32 %v162_v22, %v740_v53  ;;  %v231_v15 = vmul.f32 %v215_v3, %v215_v3 }
  0x6d   : > { %v249_v17 = vsel %vm169_vm0, %v229_v8, 0.0  ;;  %v218_v20 = vsub.f32 %v163_v25, %v740_v53  ;;  %v232_v21 = vmul.f32 %v216_v11, %v216_v11  ;;  %v251_v16 = vsel %vm169_vm0, %v230_v10, 0.0 }
  0x6e   : > { %v244_v9 = vadd.f32 %v243_v1, %v242_v2  ;;  %v219_v24 = vsub.f32 %v164_v28, %v740_v53  ;;  %v233_v26 = vmul.f32 %v217_v14, %v217_v14  ;;  %v253_v19 = vsel %vm169_vm0, %v231_v15, 0.0 }
  0x6f   : > { %v220_v29 = vsub.f32 %v165_v31, %v740_v53  ;;  %v234_v30 = vmul.f32 %v218_v20, %v218_v20  ;;  %v255_v22 = vsel %vm169_vm0, %v232_v21, 0.0  ;;  %v221_v33 = vsub.f32 %v166_v34, %v740_v53 }
  0x70   : > { %v246_v13 = vadd.f32 %v245_v7, %v244_v9  ;;  %v235_v35 = vmul.f32 %v219_v24, %v219_v24  ;;  %v257_v25 = vsel %vm169_vm0, %v233_v26, 0.0  ;;  %v222_v38 = vsub.f32 %v167_v37, %v740_v53 }
  0x71   : > { %v236_v39 = vmul.f32 %v220_v29, %v220_v29  ;;  %v259_v28 = vsel %vm169_vm0, %v234_v30, 0.0  ;;  %v223_v42 = vsub.f32 %v168_v40, %v740_v53  ;;  %v237_v43 = vmul.f32 %v221_v33, %v221_v33 }
  0x72   : > { %v248_v18 = vadd.f32 %v247_v12, %v246_v13  ;;  %v261_v31 = vsel %vm169_vm0, %v235_v35, 0.0  ;;  %v238_v45 = vmul.f32 %v222_v38, %v222_v38  ;;  %v277_v58 = vmul.f32 128.0, %v740_v53 }
  0x73   : > { %v263_v46 = vsel %vm169_vm0, %v236_v39, 0.0  ;;  %v239_v47 = vmul.f32 %v223_v42, %v223_v42  ;;  %v265_v48 = vsel %vm169_vm0, %v237_v43, 0.0  ;;  %v563_v5 = vmov (!%p384_p7), 0.0  }
  0x74   : > { %v250_v23 = vadd.f32 %v249_v17, %v248_v18  ;;  %v267_v37 = vsel %vm169_vm0, %v238_v45, 0.0  ;;  %v278_v61 = vmul.f32 %v277_v58, %v740_v53  ;;  %288 = vst.msk [vmem:[%s703_s14] sm:$0x7] (!%p384_p7), %vm287_vm3, %v563_v5 }
  0x75   : > { %v269_v51 = vsel %vm169_vm0, %v239_v47, 0.0 }
  0x76   : > { %v252_v27 = vadd.f32 %v251_v16, %v250_v23 }
  0x78   : > { %v254_v32 = vadd.f32 %v253_v19, %v252_v27 }
  0x7a   : > { %v256_v36 = vadd.f32 %v255_v22, %v254_v32 }
  0x7c   : > { %v258_v41 = vadd.f32 %v257_v25, %v256_v36 }
  0x7e   : > { %v260_v44 = vadd.f32 %v259_v28, %v258_v41 }
  0x80   : > { %v262_v34 = vadd.f32 %v261_v31, %v260_v44 }
  0x82   : > { %v264_v49 = vadd.f32 %v263_v46, %v262_v34 }
  0x84   : > { %v266_v50 = vadd.f32 %v265_v48, %v264_v49 }
  0x86   : > { %v268_v54 = vadd.f32 %v267_v37, %v266_v50 }
  0x88   : > { %v270_v55 = vadd.f32 %v269_v51, %v268_v54 }
  0x8a   : > { %v271_v40 = vrot.slane %v270_v55, 4 }
  0x8c   : > { %v272_v56 = vadd.f32 %v271_v40, %v270_v55 }
  0x8e   : > { %v273_v57 = vrot.slane %v272_v56, 2 }
  0x90   : > { %v274_v59 = vadd.f32 %v273_v57, %v272_v56 }
  0x91   : > { %286 = sbr.rel (%p384_p7) target bundleno = 152 (0x98), region = 32 }
  0x92   : > { %v275_v60 = vrot.slane %v274_v59, 1 }
  0x94   : > { %v276_v62 = vadd.f32 %v275_v60, %v274_v59 }
  0x96   : > { %v280_v63 = vsel %vm279_vm1, %v737_v52, %v276_v62 }
  0x97   : > { %v282_v4 = vsel %vm281_vm2, %v280_v63, %v278_v61 }
  0x98 PF: > { %v289_v6 = vld [vmem:[%s703_s14] sm:$0x7]  ;;  %vm291_vm4 = vcmask 518144  }
  0x99   : > { %v290_v0 = vadd.f32 %v289_v6, %v282_v4 }
  0x9b   : > { %292 = vst.msk [vmem:[%s703_s14] sm:$0x7] %vm291_vm4, %v290_v0 }
  0x9c PF: > { %s14_s13 = sadd.s32 1, %s558_s13   ;;  %s811_s6 = smov %s534_s7 }
  0x9d   : > { %p11_p11 = scmp.ge.s32.totalorder %s14_s13, 6   ;;  %s812_s7 = smov %s538_s8 }
  0x9e   : > { %s813_s8 = smov %s641_s26  ;;  %s814_s9 = smov %s550_s11 }
  0x9f   : > { %s815_s10 = smov %s554_s12  ;;  %s816_s11 = smov %s819_s15 }
  0xa0   : > { %s817_s12 = smov %s823_s16  ;;  %13 = sbr.rel (!%p11_p11) target bundleno = 5 (0x5), region = 68 }
  0xa7   :  { %312 = vsyncpa [#allocation3], 1 }
  0xa8   :  { %314 = vsyncpa [#allocation3 + $0x1], 1 }

</bundles_post_ra>
